<compile_context>
chip_gen: v7x
topology: tpu7x:2x2x1
jax: 0.10.0
libtpu: 0.0.40
codegen_flags: <defaults>
</compile_context>

<pallas_src>
import numpy as np
import jax
import jax.numpy as jnp
from jax.experimental import pallas as pl
from jax.experimental.pallas import tpu as pltpu

POOL_SIZES = (1, 2, 4, 6)


# ----------------------------------------------------------------------------
# Host-side glue: pooling membership / bilinear-upsample matrices (index math only)
# ----------------------------------------------------------------------------
def _adaptive_pool_matrix_1d(out_size, in_size):
    """0/1 membership matrix + per-bin element counts (PyTorch adaptive pooling bins)."""
    P = np.zeros((out_size, in_size), dtype=np.float32)
    cnt = np.zeros((out_size,), dtype=np.float32)
    for a in range(out_size):
        start = (a * in_size) // out_size
        end = -((-(a + 1) * in_size) // out_size)  # ceil((a+1)*in/out)
        P[a, start:end] = 1.0
        cnt[a] = end - start
    return P, cnt


def _bilinear_up_matrix_1d(out_size, in_size):
    # align_corners=True
    U = np.zeros((out_size, in_size), dtype=np.float32)
    if in_size == 1:
        U[:, 0] = 1.0
        return U
    scale = (in_size - 1) / (out_size - 1)
    for i in range(out_size):
        src = i * scale
        i0 = min(int(np.floor(src)), in_size - 1)
        frac = src - i0
        i1 = min(i0 + 1, in_size - 1)
        U[i, i0] += 1.0 - frac
        U[i, i1] += frac
    return U


def _stage_matrices(H, W, p):
    Py, cy = _adaptive_pool_matrix_1d(p, H)
    Px, cx = _adaptive_pool_matrix_1d(p, W)
    Uy = _bilinear_up_matrix_1d(H, p)
    Ux = _bilinear_up_matrix_1d(W, p)
    P2d = np.kron(Py, Px)                  # (p*p, H*W), 0/1 membership
    inv_cnt = 1.0 / np.kron(cy, cx)        # (p*p,) exact averaging scale
    U2d = np.kron(Uy, Ux)                  # (H*W, p*p)
    return P2d, inv_cnt, U2d


# ----------------------------------------------------------------------------
# Pallas kernel: bn images per grid step, channels-first (C, HW) layout.
# ----------------------------------------------------------------------------
def ppm_kernel(x_ref,       # (bn, C, HW)     input dtype (f32 or bf16)
               pcatT_ref,   # (HW, PPpad)     bf16  0/1 pooling membership, all stages
               ucatT_ref,   # (PPpad, HW)     bf16  bilinear upsample, all stages
               wfxT_ref,    # (Cout, C)       bf16  identity-branch weight (BN-scaled)
               wstk_ref,    # (Cout, S*C)     bf16  folded per-stage weights (BN-scaled)
               masks_ref,   # (S, PPpad)      f32   per-stage column mask * 1/bin_size
               shift_ref,   # (Cout, 1)       f32   folded BN shift
               o_ref):      # (bn, Cout, HW)  bf16
    n_stage, pp_pad = masks_ref.shape
    s_times_c = wstk_ref.shape[1]
    c = s_times_c // n_stage

    pcatT = pcatT_ref[...]
    ucatT = ucatT_ref[...]
    wfxT = wfxT_ref[...]
    wstk = wstk_ref[...]
    masks = masks_ref[...]
    shift = shift_ref[...]

    for b in range(x_ref.shape[0]):                       # unrolled at trace time
        x = x_ref[b].astype(jnp.bfloat16)                 # (C, HW) bf16 MXU operand

        # Identity branch of the concat through the (BN-scaled) final 1x1 conv.
        acc = jnp.dot(wfxT, x, preferred_element_type=jnp.float32)       # (Cout, HW)

        # Shared pooling for all pyramid levels: 0/1 membership sums in one matmul.
        pooled = jnp.dot(x, pcatT, preferred_element_type=jnp.float32)   # (C, PPpad)

        # Per-stage column selection + exact f32 1/bin_size scale, stacked along K,
        # then ONE merged K = S*C matmul instead of four K = C matmuls.
        pooled_m = jnp.concatenate(
            [pooled * masks[i:i + 1, :] for i in range(n_stage)], axis=0)  # (S*C, PPpad)
        stacked = jnp.dot(wstk, pooled_m.astype(jnp.bfloat16),
                          preferred_element_type=jnp.float32)             # (Cout, PPpad)

        # One bilinear-upsample matmul for all stages.
        # TODO(synk): for large HW, fuse this with the identity matmul via
        # K-concatenation ([wfxT | stacked] @ [x ; ucatT]) to drop one f32 pass
        # over the (Cout, HW) temporary; not worth the RHS staging copy here.
        acc = acc + jnp.dot(stacked.astype(jnp.bfloat16), ucatT,
                            preferred_element_type=jnp.float32)           # (Cout, HW)

        # Folded BatchNorm shift + ReLU (f32 epilogue), bf16 store.
        o_ref[b] = jnp.maximum(acc + shift, 0.0).astype(o_ref.dtype)


# ----------------------------------------------------------------------------
# Wrapper
# ----------------------------------------------------------------------------
def pyramid_pooling_forward(x_nchw, params):
    N, C, H, W = x_nchw.shape
    HW = H * W
    hid = C // 4
    Wf = params["w_final"]                   # (2C, Cout)
    Cout = Wf.shape[1]
    n_stage = len(POOL_SIZES)

    # FREE layout change only (no host-side cast / extra HBM round trip): the kernel
    # casts to bf16 itself. If activations are already bf16 upstream, they pass
    # through untouched (preferred on v7x, where an f32 x block costs 2x VMEM).
    x_cf = x_nchw.reshape(N, C, HW)

    # Concatenated pooling / upsample matrices + per-stage masks, zero-padded so the
    # pooled-column axis is a lane multiple (PP = 57 -> PP_pad = 128).
    P_T, U_T, inv_cnts = [], [], []
    for p in POOL_SIZES:
        P2d, inv_cnt, U2d = _stage_matrices(H, W, p)
        P_T.append(P2d.T)                    # (HW, p*p) 0/1
        U_T.append(U2d.T)                    # (p*p, HW)
        inv_cnts.append(inv_cnt)
    PcatT_np = np.concatenate(P_T, axis=1)   # (HW, PP)
    UcatT_np = np.concatenate(U_T, axis=0)   # (PP, HW)
    PP = PcatT_np.shape[1]
    PP_pad = ((PP + 127) // 128) * 128
    PcatT_np = np.pad(PcatT_np, ((0, 0), (0, PP_pad - PP)))
    UcatT_np = np.pad(UcatT_np, ((0, PP_pad - PP), (0, 0)))
    masks_np = np.zeros((n_stage, PP_pad), np.float32)
    off = 0
    for i, p in enumerate(POOL_SIZES):
        masks_np[i, off:off + p * p] = inv_cnts[i]
        off += p * p

    # Fold eval-mode BN: scale into the final-conv weights, keep only shift in-kernel.
    eps = 1e-5
    scale = params["bn_gamma"] / jnp.sqrt(params["bn_var"] + eps)    # (Cout,)
    shift = params["bn_beta"] - params["bn_mean"] * scale            # (Cout,)

    # Identity-branch weight (Cout, C), BN-scaled.
    wfxT = (Wf[:C].T * scale[:, None]).astype(jnp.bfloat16)
    # Per-stage folded weights, concatenated along K: (Cout, S*C).
    wstk_blocks = []
    for i in range(n_stage):
        Wc = params["w_stage"][i] @ Wf[C + i * hid: C + (i + 1) * hid]   # (C, Cout)
        wstk_blocks.append(Wc.T * scale[:, None])                        # (Cout, C)
    wstk = jnp.concatenate(wstk_blocks, axis=1).astype(jnp.bfloat16)     # (Cout, S*C)

    pcatT = jnp.asarray(PcatT_np, jnp.bfloat16)
    ucatT = jnp.asarray(UcatT_np, jnp.bfloat16)
    masks_j = jnp.asarray(masks_np)                                      # f32
    shift_col = shift.reshape(Cout, 1).astype(jnp.float32)

    # Images per grid step: batch tiny images to amortize ~0.35us/step overhead, but
    # keep >= 2 grid steps when N >= 2 so both v7x TensorCores get work.
    # TODO(synk): if N == 1 on v7x, add a second "parallel" grid axis over HW tiles.
    target_elems = 1 << 20
    bn = max(1, min(N, target_elems // max(C * HW, 1)))
    if N >= 2:
        bn = max(1, min(bn, N // 2))
    while N % bn:
        bn -= 1

    # Explicit scoped-VMEM limit, sized from the actual block footprint with headroom.
    in_bytes = jnp.dtype(x_cf.dtype).itemsize
    block_bytes = (2 * bn * C * HW * in_bytes            # x block, double-buffered
                   + 2 * bn * Cout * HW * 2              # bf16 out block, double-buffered
                   + 2 * 2 * HW * PP_pad * 2             # PcatT + UcatT (worst case 2x)
                   + 2 * (Cout * C + Cout * n_stage * C) * 2   # weights
                   + 4 * Cout * HW                       # f32 accumulator
                   + 4 * (n_stage + 1) * C * PP_pad)     # pooled + masked intermediates
    vmem_limit = int(min(100 << 20, max(32 << 20, 4 * block_bytes)))

    # TODO(synk): for very large H*W (beyond VMEM, esp. v7x's 64 MiB) add an HW grid
    # axis: phase 1 accumulates pooled (C, PP_pad) across HW tiles into scratch,
    # phase 2 does identity + upsample + epilogue per HW tile.
    def build(single_buffer_consts):
        if single_buffer_consts:
            # Constants are re-fetched identically every grid step -> single-buffer.
            const = lambda a: pl.BlockSpec(a.shape, lambda n: (0,) * a.ndim,
                                           pipeline_mode=pl.Buffered(buffer_count=1))
        else:
            const = lambda a: pl.BlockSpec(a.shape, lambda n: (0,) * a.ndim)
        return pl.pallas_call(
            ppm_kernel,
            out_shape=jax.ShapeDtypeStruct((N, Cout, HW), jnp.bfloat16),
            grid=(N // bn,),
            in_specs=[pl.BlockSpec((bn, C, HW), lambda n: (n, 0, 0)),
                      const(pcatT), const(ucatT), const(wfxT), const(wstk),
                      const(masks_j), const(shift_col)],
            out_specs=pl.BlockSpec((bn, Cout, HW), lambda n: (n, 0, 0)),
            compiler_params=pltpu.CompilerParams(
                dimension_semantics=("parallel",),
                vmem_limit_bytes=vmem_limit),
        )

    args = (x_cf, pcatT, ucatT, wfxT, wstk, masks_j, shift_col)
    try:
        out = jax.block_until_ready(build(True)(*args))
    except Exception:
        # pipeline_mode=pl.Buffered(1) unsupported on this JAX/Mosaic version;
        # fall back to default double-buffered constants (identical results).
        out = build(False)(*args)

    # Free reshape back to NCHW; output stays bf16 (internal accumulate is f32).
    return out.reshape(N, Cout, H, W)


# ----------------------------------------------------------------------------
# Pure-JAX f32 reference (same math, no Pallas) for a sanity check.
# ----------------------------------------------------------------------------
def reference_forward(x_nchw, params):
    N, C, H, W = x_nchw.shape
    HW = H * W
    hid = C // 4
    Cout = params["w_final"].shape[1]
    x_flat = jnp.transpose(x_nchw, (0, 2, 3, 1)).reshape(N, HW, C)

    Wf = params["w_final"]
    acc = jnp.einsum("nsc,co->nso", x_flat, Wf[:C])
    for i, p in enumerate(POOL_SIZES):
        P2d, inv_cnt, U2d = _stage_matrices(H, W, p)
        pooled = jnp.einsum("ps,nsc->npc", jnp.asarray(P2d), x_flat)
        pooled = pooled * jnp.asarray(inv_cnt)[None, :, None]
        conv = jnp.einsum("npc,ch->nph", pooled, params["w_stage"][i])
        up = jnp.einsum("sp,nph->nsh", jnp.asarray(U2d), conv)
        acc = acc + jnp.einsum("nsh,ho->nso", up, Wf[C + i * hid: C + (i + 1) * hid])

    eps = 1e-5
    scale = params["bn_gamma"] / jnp.sqrt(params["bn_var"] + eps)
    shift = params["bn_beta"] - params["bn_mean"] * scale
    y = jnp.maximum(acc * scale + shift, 0.0)
    return y.reshape(N, H, W, Cout).transpose(0, 3, 1, 2)


if __name__ == "__main__":
    # Small deterministic config: in_channels=8 (hid=2), out_channels=16, 16x16.
    N, C, H, W = 2, 8, 16, 16
    Cout = 16
    hid = C // 4

    key = jax.random.PRNGKey(0)
    keys = jax.random.split(key, 10)

    params = {
        # conv1x1 in each pyramid stage: bias=False (bare 1x1 conv per the spec)
        "w_stage": [0.2 * jax.random.normal(keys[i], (C, hid), jnp.float32)
                    for i in range(4)],
        # PWConvBNAct: 1x1 conv (2C -> Cout, bias=False) + BN + ReLU
        "w_final": 0.2 * jax.random.normal(keys[4], (2 * C, Cout), jnp.float32),
        "bn_gamma": 0.5 + jax.random.uniform(keys[5], (Cout,), jnp.float32),
        "bn_beta": 0.1 * jax.random.normal(keys[6], (Cout,), jnp.float32),
        "bn_mean": 0.1 * jax.random.normal(keys[7], (Cout,), jnp.float32),
        "bn_var": 0.5 + jax.random.uniform(keys[8], (Cout,), jnp.float32),
    }

    x = jax.random.normal(keys[9], (N, C, H, W), jnp.float32)

    out = pyramid_pooling_forward(x, params)
    out = jax.block_until_ready(out)

    ref = jax.block_until_ready(reference_forward(x, params))
    # Relaxed tolerance: kernel uses bf16 MXU operands and a bf16 output
    # (f32 accumulation inside); reference is pure f32.
    np.testing.assert_allclose(np.asarray(out.astype(jnp.float32)), np.asarray(ref),
                               rtol=5e-2, atol=1e-1)
    assert out.shape == (N, Cout, H, W)

    print("KERNEL_OK")
</pallas_src>

<mosaic_0001>
module attributes {stable_mosaic.version = 11 : i64} {
  func.func @ppm_kernel(%arg0: i32, %arg1: memref<1x8x256xf32, #tpu.memory_space<vmem>>, %arg2: memref<256x128xbf16, #tpu.memory_space<vmem>>, %arg3: memref<128x256xbf16, #tpu.memory_space<vmem>>, %arg4: memref<16x8xbf16, #tpu.memory_space<vmem>>, %arg5: memref<16x32xbf16, #tpu.memory_space<vmem>>, %arg6: memref<4x128xf32, #tpu.memory_space<vmem>>, %arg7: memref<16x1xf32, #tpu.memory_space<vmem>>, %arg8: memref<1x16x256xbf16, #tpu.memory_space<vmem>>) attributes {dimension_semantics = [#tpu.dimension_semantics<parallel>], iteration_bounds = array<i64: 2>, scalar_prefetch = 0 : i64, scratch_operands = 0 : i64, tpu.core_type = #tpu.core_type<tc>, window_params = [{transform_indices = @transform_0, window_bounds = array<i64: 1, 8, 256>}, {pipeline_mode = #tpu.pipeline_mode<synchronous>, transform_indices = @transform_1, window_bounds = array<i64: 256, 128>}, {pipeline_mode = #tpu.pipeline_mode<synchronous>, transform_indices = @transform_2, window_bounds = array<i64: 128, 256>}, {pipeline_mode = #tpu.pipeline_mode<synchronous>, transform_indices = @transform_3, window_bounds = array<i64: 16, 8>}, {pipeline_mode = #tpu.pipeline_mode<synchronous>, transform_indices = @transform_4, window_bounds = array<i64: 16, 32>}, {pipeline_mode = #tpu.pipeline_mode<synchronous>, transform_indices = @transform_5, window_bounds = array<i64: 4, 128>}, {pipeline_mode = #tpu.pipeline_mode<synchronous>, transform_indices = @transform_6, window_bounds = array<i64: 16, 1>}, {transform_indices = @transform_7, window_bounds = array<i64: 1, 16, 256>}]} {
    %c0 = arith.constant 0 : index
    %c0_0 = arith.constant 0 : index
    %0 = vector.load %arg2[%c0, %c0_0] : memref<256x128xbf16, #tpu.memory_space<vmem>>, vector<256x128xbf16>
    %c0_1 = arith.constant 0 : index
    %c0_2 = arith.constant 0 : index
    %1 = vector.load %arg3[%c0_1, %c0_2] : memref<128x256xbf16, #tpu.memory_space<vmem>>, vector<128x256xbf16>
    %c0_3 = arith.constant 0 : index
    %c0_4 = arith.constant 0 : index
    %2 = vector.load %arg4[%c0_3, %c0_4] : memref<16x8xbf16, #tpu.memory_space<vmem>>, vector<16x8xbf16>
    %c0_5 = arith.constant 0 : index
    %c0_6 = arith.constant 0 : index
    %3 = vector.load %arg5[%c0_5, %c0_6] : memref<16x32xbf16, #tpu.memory_space<vmem>>, vector<16x32xbf16>
    %c0_7 = arith.constant 0 : index
    %c0_8 = arith.constant 0 : index
    %4 = vector.load %arg6[%c0_7, %c0_8] : memref<4x128xf32, #tpu.memory_space<vmem>>, vector<4x128xf32>
    %c0_9 = arith.constant 0 : index
    %c0_10 = arith.constant 0 : index
    %5 = vector.load %arg7[%c0_9, %c0_10] : memref<16x1xf32, #tpu.memory_space<vmem>>, vector<16x1xf32>
    %c0_11 = arith.constant 0 : index
    %c0_12 = arith.constant 0 : index
    %c0_13 = arith.constant 0 : index
    %6 = vector.load %arg1[%c0_11, %c0_12, %c0_13] : memref<1x8x256xf32, #tpu.memory_space<vmem>>, vector<1x8x256xf32>
    %7 = vector.shape_cast %6 : vector<1x8x256xf32> to vector<8x256xf32>
    %8 = arith.truncf %7 : vector<8x256xf32> to vector<8x256xbf16>
    %cst = arith.constant dense<0.000000e+00> : vector<16x256xf32>
    %9 = tpu.matmul %2, %8, %cst {dimension_numbers = #tpu.dot_dimension_numbers<[1], [0], [0], [1], [0, 0, 1, 1], [], []>} : vector<16x8xbf16>, vector<8x256xbf16>, vector<16x256xf32> -> vector<16x256xf32>
    %cst_14 = arith.constant dense<0.000000e+00> : vector<8x128xf32>
    %10 = tpu.matmul %8, %0, %cst_14 {dimension_numbers = #tpu.dot_dimension_numbers<[1], [0], [0], [1], [0, 0, 1, 1], [], []>} : vector<8x256xbf16>, vector<256x128xbf16>, vector<8x128xf32> -> vector<8x128xf32>
    %11 = vector.extract_strided_slice %4 {offsets = [0, 0], sizes = [1, 128], strides = [1, 1]} : vector<4x128xf32> to vector<1x128xf32>
    %12 = vector.broadcast %11 : vector<1x128xf32> to vector<8x128xf32>
    %13 = arith.mulf %10, %12 : vector<8x128xf32>
    %14 = vector.extract_strided_slice %4 {offsets = [1, 0], sizes = [1, 128], strides = [1, 1]} : vector<4x128xf32> to vector<1x128xf32>
    %15 = vector.broadcast %14 : vector<1x128xf32> to vector<8x128xf32>
    %16 = arith.mulf %10, %15 : vector<8x128xf32>
    %17 = vector.extract_strided_slice %4 {offsets = [2, 0], sizes = [1, 128], strides = [1, 1]} : vector<4x128xf32> to vector<1x128xf32>
    %18 = vector.broadcast %17 : vector<1x128xf32> to vector<8x128xf32>
    %19 = arith.mulf %10, %18 : vector<8x128xf32>
    %20 = vector.extract_strided_slice %4 {offsets = [3, 0], sizes = [1, 128], strides = [1, 1]} : vector<4x128xf32> to vector<1x128xf32>
    %21 = vector.broadcast %20 : vector<1x128xf32> to vector<8x128xf32>
    %22 = arith.mulf %10, %21 : vector<8x128xf32>
    %23 = tpu.concatenate %13, %16, %19, %22 in 0 : vector<8x128xf32>, vector<8x128xf32>, vector<8x128xf32>, vector<8x128xf32> -> vector<32x128xf32>
    %24 = arith.truncf %23 : vector<32x128xf32> to vector<32x128xbf16>
    %cst_15 = arith.constant dense<0.000000e+00> : vector<16x128xf32>
    %25 = tpu.matmul %3, %24, %cst_15 {dimension_numbers = #tpu.dot_dimension_numbers<[1], [0], [0], [1], [0, 0, 1, 1], [], []>} : vector<16x32xbf16>, vector<32x128xbf16>, vector<16x128xf32> -> vector<16x128xf32>
    %26 = arith.truncf %25 : vector<16x128xf32> to vector<16x128xbf16>
    %cst_16 = arith.constant dense<0.000000e+00> : vector<16x256xf32>
    %27 = tpu.matmul %26, %1, %cst_16 {dimension_numbers = #tpu.dot_dimension_numbers<[1], [0], [0], [1], [0, 0, 1, 1], [], []>} : vector<16x128xbf16>, vector<128x256xbf16>, vector<16x256xf32> -> vector<16x256xf32>
    %28 = arith.addf %9, %27 : vector<16x256xf32>
    %29 = vector.broadcast %5 : vector<16x1xf32> to vector<16x256xf32>
    %30 = arith.addf %28, %29 : vector<16x256xf32>
    %cst_17 = arith.constant 0.000000e+00 : f32
    %31 = vector.broadcast %cst_17 : f32 to vector<16x256xf32>
    %32 = arith.maximumf %30, %31 : vector<16x256xf32>
    %33 = arith.truncf %32 : vector<16x256xf32> to vector<16x256xbf16>
    %c0_18 = arith.constant 0 : index
    %c0_19 = arith.constant 0 : index
    %c0_20 = arith.constant 0 : index
    %34 = vector.load %arg8[%c0_18, %c0_19, %c0_20] : memref<1x16x256xbf16, #tpu.memory_space<vmem>>, vector<1x16x256xbf16>
    %35 = vector.shape_cast %34 : vector<1x16x256xbf16> to vector<16x256xbf16>
    %36 = vector.shape_cast %33 : vector<16x256xbf16> to vector<1x16x256xbf16>
    tpu.vector_store %arg8[%c0_18, %c0_19, %c0_20], %36 {strides = array<i32>} : memref<1x16x256xbf16, #tpu.memory_space<vmem>>, vector<1x16x256xbf16>,
    return
  }
  func.func @transform_0(%arg0: i32) -> (i32, i32, i32) {
    %c0_i32 = arith.constant 0 : i32
    %c0_i32_0 = arith.constant 0 : i32
    %c0_i32_1 = arith.constant 0 : i32
    return %arg0, %c0_i32, %c0_i32_0 : i32, i32, i32
  }
  func.func @transform_1(%arg0: i32) -> (i32, i32) {
    %c0_i32 = arith.constant 0 : i32
    %c0_i32_0 = arith.constant 0 : i32
    %c0_i32_1 = arith.constant 0 : i32
    return %c0_i32, %c0_i32_0 : i32, i32
  }
  func.func @transform_2(%arg0: i32) -> (i32, i32) {
    %c0_i32 = arith.constant 0 : i32
    %c0_i32_0 = arith.constant 0 : i32
    %c0_i32_1 = arith.constant 0 : i32
    return %c0_i32, %c0_i32_0 : i32, i32
  }
  func.func @transform_3(%arg0: i32) -> (i32, i32) {
    %c0_i32 = arith.constant 0 : i32
    %c0_i32_0 = arith.constant 0 : i32
    %c0_i32_1 = arith.constant 0 : i32
    return %c0_i32, %c0_i32_0 : i32, i32
  }
  func.func @transform_4(%arg0: i32) -> (i32, i32) {
    %c0_i32 = arith.constant 0 : i32
    %c0_i32_0 = arith.constant 0 : i32
    %c0_i32_1 = arith.constant 0 : i32
    return %c0_i32, %c0_i32_0 : i32, i32
  }
  func.func @transform_5(%arg0: i32) -> (i32, i32) {
    %c0_i32 = arith.constant 0 : i32
    %c0_i32_0 = arith.constant 0 : i32
    %c0_i32_1 = arith.constant 0 : i32
    return %c0_i32, %c0_i32_0 : i32, i32
  }
  func.func @transform_6(%arg0: i32) -> (i32, i32) {
    %c0_i32 = arith.constant 0 : i32
    %c0_i32_0 = arith.constant 0 : i32
    %c0_i32_1 = arith.constant 0 : i32
    return %c0_i32, %c0_i32_0 : i32, i32
  }
  func.func @transform_7(%arg0: i32) -> (i32, i32, i32) {
    %c0_i32 = arith.constant 0 : i32
    %c0_i32_0 = arith.constant 0 : i32
    %c0_i32_1 = arith.constant 0 : i32
    return %arg0, %c0_i32, %c0_i32_0 : i32, i32, i32
  }
}

module attributes {stable_mosaic.version = 11 : i64} {
  func.func @ppm_kernel(%arg0: i32, %arg1: memref<1x8x256xf32, #tpu.memory_space<vmem>>, %arg2: memref<256x128xbf16, #tpu.memory_space<vmem>>, %arg3: memref<128x256xbf16, #tpu.memory_space<vmem>>, %arg4: memref<16x8xbf16, #tpu.memory_space<vmem>>, %arg5: memref<16x32xbf16, #tpu.memory_space<vmem>>, %arg6: memref<4x128xf32, #tpu.memory_space<vmem>>, %arg7: memref<16x1xf32, #tpu.memory_space<vmem>>, %arg8: memref<1x16x256xbf16, #tpu.memory_space<vmem>>) attributes {dimension_semantics = [#tpu.dimension_semantics<parallel>], iteration_bounds = array<i64: 2>, scalar_prefetch = 0 : i64, scratch_operands = 0 : i64, tpu.core_type = #tpu.core_type<tc>, window_params = [{transform_indices = @transform_0, window_bounds = array<i64: 1, 8, 256>}, {pipeline_mode = #tpu.pipeline_mode<synchronous>, transform_indices = @transform_1, window_bounds = array<i64: 256, 128>}, {pipeline_mode = #tpu.pipeline_mode<synchronous>, transform_indices = @transform_2, window_bounds = array<i64: 128, 256>}, {pipeline_mode = #tpu.pipeline_mode<synchronous>, transform_indices = @transform_3, window_bounds = array<i64: 16, 8>}, {pipeline_mode = #tpu.pipeline_mode<synchronous>, transform_indices = @transform_4, window_bounds = array<i64: 16, 32>}, {pipeline_mode = #tpu.pipeline_mode<synchronous>, transform_indices = @transform_5, window_bounds = array<i64: 4, 128>}, {pipeline_mode = #tpu.pipeline_mode<synchronous>, transform_indices = @transform_6, window_bounds = array<i64: 16, 1>}, {transform_indices = @transform_7, window_bounds = array<i64: 1, 16, 256>}]} {
    %c0 = arith.constant 0 : index
    %c0_0 = arith.constant 0 : index
    %0 = vector.load %arg2[%c0, %c0_0] : memref<256x128xbf16, #tpu.memory_space<vmem>>, vector<256x128xbf16>
    %c0_1 = arith.constant 0 : index
    %c0_2 = arith.constant 0 : index
    %1 = vector.load %arg3[%c0_1, %c0_2] : memref<128x256xbf16, #tpu.memory_space<vmem>>, vector<128x256xbf16>
    %c0_3 = arith.constant 0 : index
    %c0_4 = arith.constant 0 : index
    %2 = vector.load %arg4[%c0_3, %c0_4] : memref<16x8xbf16, #tpu.memory_space<vmem>>, vector<16x8xbf16>
    %c0_5 = arith.constant 0 : index
    %c0_6 = arith.constant 0 : index
    %3 = vector.load %arg5[%c0_5, %c0_6] : memref<16x32xbf16, #tpu.memory_space<vmem>>, vector<16x32xbf16>
    %c0_7 = arith.constant 0 : index
    %c0_8 = arith.constant 0 : index
    %4 = vector.load %arg6[%c0_7, %c0_8] : memref<4x128xf32, #tpu.memory_space<vmem>>, vector<4x128xf32>
    %c0_9 = arith.constant 0 : index
    %c0_10 = arith.constant 0 : index
    %5 = vector.load %arg7[%c0_9, %c0_10] : memref<16x1xf32, #tpu.memory_space<vmem>>, vector<16x1xf32>
    %c0_11 = arith.constant 0 : index
    %c0_12 = arith.constant 0 : index
    %c0_13 = arith.constant 0 : index
    %6 = vector.load %arg1[%c0_11, %c0_12, %c0_13] : memref<1x8x256xf32, #tpu.memory_space<vmem>>, vector<1x8x256xf32>
    %7 = vector.shape_cast %6 : vector<1x8x256xf32> to vector<8x256xf32>
    %8 = arith.truncf %7 : vector<8x256xf32> to vector<8x256xbf16>
    %cst = arith.constant dense<0.000000e+00> : vector<16x256xf32>
    %9 = tpu.matmul %2, %8, %cst {dimension_numbers = #tpu.dot_dimension_numbers<[1], [0], [0], [1], [0, 0, 1, 1], [], []>} : vector<16x8xbf16>, vector<8x256xbf16>, vector<16x256xf32> -> vector<16x256xf32>
    %cst_14 = arith.constant dense<0.000000e+00> : vector<8x128xf32>
    %10 = tpu.matmul %8, %0, %cst_14 {dimension_numbers = #tpu.dot_dimension_numbers<[1], [0], [0], [1], [0, 0, 1, 1], [], []>} : vector<8x256xbf16>, vector<256x128xbf16>, vector<8x128xf32> -> vector<8x128xf32>
    %11 = vector.extract_strided_slice %4 {offsets = [0, 0], sizes = [1, 128], strides = [1, 1]} : vector<4x128xf32> to vector<1x128xf32>
    %12 = vector.broadcast %11 : vector<1x128xf32> to vector<8x128xf32>
    %13 = arith.mulf %10, %12 : vector<8x128xf32>
    %14 = vector.extract_strided_slice %4 {offsets = [1, 0], sizes = [1, 128], strides = [1, 1]} : vector<4x128xf32> to vector<1x128xf32>
    %15 = vector.broadcast %14 : vector<1x128xf32> to vector<8x128xf32>
    %16 = arith.mulf %10, %15 : vector<8x128xf32>
    %17 = vector.extract_strided_slice %4 {offsets = [2, 0], sizes = [1, 128], strides = [1, 1]} : vector<4x128xf32> to vector<1x128xf32>
    %18 = vector.broadcast %17 : vector<1x128xf32> to vector<8x128xf32>
    %19 = arith.mulf %10, %18 : vector<8x128xf32>
    %20 = vector.extract_strided_slice %4 {offsets = [3, 0], sizes = [1, 128], strides = [1, 1]} : vector<4x128xf32> to vector<1x128xf32>
    %21 = vector.broadcast %20 : vector<1x128xf32> to vector<8x128xf32>
    %22 = arith.mulf %10, %21 : vector<8x128xf32>
    %23 = tpu.concatenate %13, %16, %19, %22 in 0 : vector<8x128xf32>, vector<8x128xf32>, vector<8x128xf32>, vector<8x128xf32> -> vector<32x128xf32>
    %24 = arith.truncf %23 : vector<32x128xf32> to vector<32x128xbf16>
    %cst_15 = arith.constant dense<0.000000e+00> : vector<16x128xf32>
    %25 = tpu.matmul %3, %24, %cst_15 {dimension_numbers = #tpu.dot_dimension_numbers<[1], [0], [0], [1], [0, 0, 1, 1], [], []>} : vector<16x32xbf16>, vector<32x128xbf16>, vector<16x128xf32> -> vector<16x128xf32>
    %26 = arith.truncf %25 : vector<16x128xf32> to vector<16x128xbf16>
    %cst_16 = arith.constant dense<0.000000e+00> : vector<16x256xf32>
    %27 = tpu.matmul %26, %1, %cst_16 {dimension_numbers = #tpu.dot_dimension_numbers<[1], [0], [0], [1], [0, 0, 1, 1], [], []>} : vector<16x128xbf16>, vector<128x256xbf16>, vector<16x256xf32> -> vector<16x256xf32>
    %28 = arith.addf %9, %27 : vector<16x256xf32>
    %29 = vector.broadcast %5 : vector<16x1xf32> to vector<16x256xf32>
    %30 = arith.addf %28, %29 : vector<16x256xf32>
    %cst_17 = arith.constant 0.000000e+00 : f32
    %31 = vector.broadcast %cst_17 : f32 to vector<16x256xf32>
    %32 = arith.maximumf %30, %31 : vector<16x256xf32>
    %33 = arith.truncf %32 : vector<16x256xf32> to vector<16x256xbf16>
    %c0_18 = arith.constant 0 : index
    %c0_19 = arith.constant 0 : index
    %c0_20 = arith.constant 0 : index
    %34 = vector.load %arg8[%c0_18, %c0_19, %c0_20] : memref<1x16x256xbf16, #tpu.memory_space<vmem>>, vector<1x16x256xbf16>
    %35 = vector.shape_cast %34 : vector<1x16x256xbf16> to vector<16x256xbf16>
    %36 = vector.shape_cast %33 : vector<16x256xbf16> to vector<1x16x256xbf16>
    tpu.vector_store %arg8[%c0_18, %c0_19, %c0_20], %36 {strides = array<i32>} : memref<1x16x256xbf16, #tpu.memory_space<vmem>>, vector<1x16x256xbf16>,
    return
  }
  func.func @transform_0(%arg0: i32) -> (i32, i32, i32) {
    %c0_i32 = arith.constant 0 : i32
    %c0_i32_0 = arith.constant 0 : i32
    %c0_i32_1 = arith.constant 0 : i32
    return %arg0, %c0_i32, %c0_i32_0 : i32, i32, i32
  }
  func.func @transform_1(%arg0: i32) -> (i32, i32) {
    %c0_i32 = arith.constant 0 : i32
    %c0_i32_0 = arith.constant 0 : i32
    %c0_i32_1 = arith.constant 0 : i32
    return %c0_i32, %c0_i32_0 : i32, i32
  }
  func.func @transform_2(%arg0: i32) -> (i32, i32) {
    %c0_i32 = arith.constant 0 : i32
    %c0_i32_0 = arith.constant 0 : i32
    %c0_i32_1 = arith.constant 0 : i32
    return %c0_i32, %c0_i32_0 : i32, i32
  }
  func.func @transform_3(%arg0: i32) -> (i32, i32) {
    %c0_i32 = arith.constant 0 : i32
    %c0_i32_0 = arith.constant 0 : i32
    %c0_i32_1 = arith.constant 0 : i32
    return %c0_i32, %c0_i32_0 : i32, i32
  }
  func.func @transform_4(%arg0: i32) -> (i32, i32) {
    %c0_i32 = arith.constant 0 : i32
    %c0_i32_0 = arith.constant 0 : i32
    %c0_i32_1 = arith.constant 0 : i32
    return %c0_i32, %c0_i32_0 : i32, i32
  }
  func.func @transform_5(%arg0: i32) -> (i32, i32) {
    %c0_i32 = arith.constant 0 : i32
    %c0_i32_0 = arith.constant 0 : i32
    %c0_i32_1 = arith.constant 0 : i32
    return %c0_i32, %c0_i32_0 : i32, i32
  }
  func.func @transform_6(%arg0: i32) -> (i32, i32) {
    %c0_i32 = arith.constant 0 : i32
    %c0_i32_0 = arith.constant 0 : i32
    %c0_i32_1 = arith.constant 0 : i32
    return %c0_i32, %c0_i32_0 : i32, i32
  }
  func.func @transform_7(%arg0: i32) -> (i32, i32, i32) {
    %c0_i32 = arith.constant 0 : i32
    %c0_i32_0 = arith.constant 0 : i32
    %c0_i32_1 = arith.constant 0 : i32
    return %arg0, %c0_i32, %c0_i32_0 : i32, i32, i32
  }
}

</mosaic_0001>

<bundles_post_ra>
// kernel: tpu_custom_call.1
= control target key start
LH: loop header
LB: loop body
LE: loop exit
PB: predicated region body
PF: predicated region fallthrough
CT: control target
= control target key end

     0   :  { %12 = vsyncpa [#allocation3], 0  ;;  %s1603_s0 = inlined_call_operand.hbm [shape: f32[2,8,256], index: 0, kind: input, shape index: {}]   ;;  %s1604_s1 = inlined_call_operand.hbm [shape: bf16[256,128], index: 1, kind: input, shape index: {}]   ;;  %s1605_s2 = inlined_call_operand.hbm [shape: bf16[128,256], index: 2, kind: input, shape index: {}]   ;;  %s1606_s3 = inlined_call_operand.vmem [shape: bf16[16,8], index: 3, kind: input, shape index: {}]   ;;  %s1607_s4 = inlined_call_operand.vmem [shape: bf16[16,32], index: 4, kind: input, shape index: {}]   ;;  %s1608_s5 = inlined_call_operand.vmem [shape: f32[4,128], index: 5, kind: input, shape index: {}]   ;;  %s1609_s6 = inlined_call_operand.vmem [shape: f32[16,1], index: 6, kind: input, shape index: {}]   ;;  %s1610_s7 = inlined_call_operand.hbm [shape: bf16[2,16,256], index: 7, kind: output, shape index: {}]  }
   0x1   :  { %14 = vsyncpa [#allocation3 + $0x1], 0 }
   0x2   :  { %15 = vsyncpa [#allocation6], 0 }
   0x3   :  { %16 = vsyncpa [#allocation4], 0 }
   0x4   :  { %18 = vsyncpa [#allocation4 + $0x1], 0  ;;  %s1341_s24 = smov 0   ;;  %s1343_s25 = smov 0  }
   0x5   :  { %s1345_s26 = smov 0   ;;  %s1347_s27 = smov 0  }
   0x6 LB: > { %s1362_s28 = sadd.s32 4294967295, %s1286_s27   ;;  %s913_s29 = sadd.s32 4294967294, %s1286_s27   ;;  %s1286_s27 = sphi %s1347_s27, %s1630_s27   ;;  %s1282_s26 = sphi %s1345_s26, %s1629_s26   ;;  %s1278_s25 = sphi %s1343_s25, %s1628_s25   ;;  %s1274_s24 = sphi %s1341_s24, %s1627_s24  }
   0x7   : > { %p44_p0 = scmp.ne.s32.totalorder %s1278_s25, %s1274_s24  ;;  %p1611_p1 = scmp.eq.s32.totalorder %s1362_s28, 0 }
   0x8   : > { %p200_p3 = scmp.eq.s32.totalorder %s913_s29, 1  ;;  %p914_p5 = scmp.ge.s32.totalorder %s1286_s27, 1 }
   0x9   : > { %p1371_p4 = por %p1611_p1, %p44_p0  ;;  %p207_p7 = scmp.lt.s32.totalorder %s1286_s27, 3 }
   0xa   : > { %p1376_p6 = por %p200_p3, %p44_p0  ;;  %s1288_s10 = smov [#allocation5]  }
   0xb   : > { %s1614_s30 = scalar_select %p1371_p4, 1, 0 }
   0xc   : > { %s1615_s8 = scalar_select %p1376_p6, 1, 0 }
   0xd   : > { %p1381_p8 = pnand %p914_p5, %p207_p7  ;;  %s219_s11 = sshll.u32 %s1288_s10, 4  ;;  %s1385_s11 = int_to_ptr.vmem [resolvable:$true] %s219_s11 }
   0xe   : > { %s1289_s13 = smov [#allocation7]   ;;  %s1130_s17 = scalar_lea.hbm %s1604_s1, 2048 }
   0xf   : > { %p1023_p9 = pneg %p1381_p8  ;;  %s232_s14 = sshll.u32 %s1289_s13, 4  ;;  %s1396_s14 = int_to_ptr.vmem [resolvable:$true] %s232_s14 }
  0x10   : > { %p1131_p12 = scmp.ne.s32.totalorder %s1604_s1, %s1130_s17  ;;  %p1137_p5 = scmp.lt.u32.totalorder %s1130_s17, %s1604_s1 }
  0x11   : > { %p1392_p11 = pnand %p1023_p9, %p1611_p1 }
  0x13   : > { %p1132_p13 = pneg %p1392_p11 }
  0x15   : > { %p1133_p0 = pnand %p1132_p13, %p1131_p12 }
  0x17   : > { %p1134_p3 = pneg %p1133_p0 }
  0x19   : > { %p1139_p7 = pnand %p1137_p5, %p1134_p3 }
  0x1b   : > { %1142 = shalt.err (!%p1139_p7)
}
  0x1c   : > { %s1143_s22 = scalar_lea.vmem %s1385_s11, 2048  ;;  %p1151_p2 = scmp.lt.s32.totalorder %s1385_s11, %s1385_s11 }
  0x1d   : > { %p1144_p9 = scmp.ne.s32.totalorder %s1385_s11, %s1143_s22  ;;  %p1152_p12 = scmp.lt.s32.totalorder %s1143_s22, %s1143_s22 }
  0x1f   : > { %p1146_p10 = pnand %p1144_p9, %p1132_p13  ;;  %p1153_p0 = por %p1152_p12, %p1151_p2 }
  0x21   : > { %p1147_p1 = pneg %p1146_p10 }
  0x23   : > { %p1154_p6 = pnand %p1153_p0, %p1147_p1 }
  0x25   : > { %1157 = shalt.err (!%p1154_p6)
}
  0x26   : > { %s1290_s23 = smov 64   ;;  %s1291_s29 = smov 4  }
  0x27   : > { %1026 = dma.hbm_to_vmem [thread:$0]  (!%p1392_p11), %s1604_s1, 2048, %s1385_s11, [#allocation6], %s1290_s23, %s1290_s23, %s1291_s29  }
  0x28   : > { %s1158_s17 = scalar_lea.hbm %s1605_s2, 2048 }
  0x29   : > { %p1159_p2 = scmp.ne.s32.totalorder %s1605_s2, %s1158_s17  ;;  %p1165_p10 = scmp.lt.u32.totalorder %s1158_s17, %s1605_s2 }
  0x2b   : > { %p1161_p1 = pnand %p1159_p2, %p1132_p13 }
  0x2d   : > { %p1162_p6 = pneg %p1161_p1 }
  0x2f   : > { %p1167_p3 = pnand %p1165_p10, %p1162_p6 }
  0x31   : > { %1170 = shalt.err (!%p1167_p3)
}
  0x32   : > { %s1171_s11 = scalar_lea.vmem %s1396_s14, 2048  ;;  %p1179_p12 = scmp.lt.s32.totalorder %s1396_s14, %s1396_s14 }
  0x33   : > { %p1172_p5 = scmp.ne.s32.totalorder %s1396_s14, %s1171_s11  ;;  %p1180_p0 = scmp.lt.s32.totalorder %s1171_s11, %s1171_s11 }
  0x35   : > { %p1174_p7 = pnand %p1172_p5, %p1132_p13  ;;  %p1181_p2 = por %p1180_p0, %p1179_p12 }
  0x37   : > { %p1175_p9 = pneg %p1174_p7 }
  0x39   : > { %p1182_p1 = pnand %p1181_p2, %p1175_p9 }
  0x3b   : > { %1185 = shalt.err (!%p1182_p1)
}
  0x3c   : > { %s1292_s22 = smov 128   ;;  %s1293_s23 = smov 8  }
  0x3d   : > { %1029 = dma.hbm_to_vmem [thread:$0]  (!%p1392_p11), %s1605_s2, 2048, %s1396_s14, [#allocation6], %s1292_s22, %s1292_s22, %s1293_s23  }
  0x3e   : > { %s1451_s13 = sadd.s32 1, %s1286_s27   ;;  %s31_s16 = sadd.s32 1, %s1282_s26 }
  0x3f   : > { %s28_s15 = ssub.s32 %s1286_s27, %s1451_s13  ;;  %p38_p6 = scmp.ne.s32.totalorder %s1282_s26, %s1278_s25 }
  0x40   : > { %p29_p13 = scmp.eq.s32.totalorder %s28_s15, 0  ;;  %p39_p10 = scmp.eq.s32.totalorder %s1286_s27, 0 }
  0x41   : > { %p1618_p5 = scmp.eq.s32.totalorder %s1362_s28, 1  ;;  %p1040_p9 = scmp.lt.s32.totalorder %s1286_s27, 2 }
  0x42   : > { %s1460_s17 = scalar_select %p29_p13, %s1282_s26, %s31_s16  }
  0x43   : > { %p40_p3 = por %p39_p10, %p38_p6  ;;  %p1464_p7 = por %p1618_p5, %p38_p6 }
  0x44   : > { %s258_s12 = sand.u32 1, %s1282_s26   ;;  %s970_s14 = sshll.u32 %s1286_s27, 8 }
  0x45   : > { %s1619_s18 = scalar_select %p1464_p7, 1, 0 }
  0x46   : > { %s918_s19 = sshll.u32 %s258_s12, 4  ;;  %s1474_s11 = scalar_lea.hbm %s1603_s0, %s970_s14 }
  0x47   : > { %s262_s22 = scalar_lea.vmem [#allocation2], %s918_s19  ;;  %p1478_p11 = pnand %p1040_p9, %p40_p3 }
  0x48   : > { %s270_s23 = sshll.u32 %s262_s22, 4  ;;  %s259_s10 = scalar_lea.sflag [#allocation3], %s258_s12  ;;  %s1476_s23 = int_to_ptr.vmem [resolvable:$true] %s270_s23 }
  0x49   : > { %s1186_s15 = scalar_lea.hbm %s1474_s11, 256  ;;  %p1188_p0 = pneg %p1478_p11 }
  0x4a   : > { %p1187_p12 = scmp.ne.s32.totalorder %s1474_s11, %s1186_s15  ;;  %s1191_s14 = scalar_lea.hbm %s1603_s0, 512 }
  0x4b   : > { %p1192_p13 = scmp.lt.u32.totalorder %s1474_s11, %s1603_s0  ;;  %p1193_p6 = scmp.lt.u32.totalorder %s1191_s14, %s1186_s15 }
  0x4c   : > { %p1189_p2 = pnand %p1188_p0, %p1187_p12  ;;  %p1195_p3 = scmp.lt.u32.totalorder %s1186_s15, %s1474_s11 }
  0x4d   : > { %p1194_p10 = por %p1193_p6, %p1192_p13 }
  0x4e   : > { %p1190_p1 = pneg %p1189_p2 }
  0x4f   : > { %p1196_p5 = por %p1195_p3, %p1194_p10 }
  0x51   : > { %p1197_p9 = pnand %p1196_p5, %p1190_p1 }
  0x53   : > { %1200 = shalt.err (!%p1197_p9)
}
  0x54   : > { %s1201_s12 = scalar_lea.vmem %s1476_s23, 256  ;;  %s1294_s22 = smov [#allocation2]  }
  0x55   : > { %p1202_p12 = scmp.ne.s32.totalorder %s1476_s23, %s1201_s12  ;;  %s1206_s16 = sshll.u32 %s1294_s22, 4  ;;  %s1207_s16 = int_to_ptr.vmem [resolvable:$false] %s1206_s16 }
  0x56   : > { %s1208_s19 = scalar_lea.vmem %s1207_s16, 512  ;;  %p1209_p4 = scmp.lt.s32.totalorder %s1476_s23, %s1207_s16 }
  0x57   : > { %p1204_p2 = pnand %p1202_p12, %p1188_p0  ;;  %p1210_p13 = scmp.lt.s32.totalorder %s1208_s19, %s1201_s12 }
  0x59   : > { %p1205_p7 = pneg %p1204_p2  ;;  %p1211_p6 = por %p1210_p13, %p1209_p4 }
  0x5b   : > { %p1212_p10 = pnand %p1211_p6, %p1205_p7 }
  0x5d   : > { %1215 = shalt.err (!%p1212_p10)
}
  0x5e   : > { %1033 = dma.hbm_to_vmem [thread:$0]  (!%p1478_p11), %s1474_s11, 256, %s1476_s23, %s259_s10  }
  0x5f   : > { %279 = sbr.rel (%p1381_p8) target bundleno = 829 (0x33d), region = 48  ;;  %s1510_s15 = sand.u32 (!%p1381_p8), 1, %s1278_s25  }
  0x60   : > { %s922_s14 = sshll.u32 (!%p1381_p8), %s1510_s15, 4  ;;  %s282_s20 = scalar_lea.sflag (!%p1381_p8), [#allocation3], %s1510_s15 }
  0x61   : > { %s1516_s21 = scalar_lea.vmem (!%p1381_p8), [#allocation2], %s922_s14  ;;  %p1621_p4 = scmp.ne.s32.totalorder (!%p1381_p8), %s1614_s30, 0 }
  0x66   : > { %1261 = dma.done.wait (%p1621_p4), %s282_s20, 256  }
  0x67   : > { %1263 = vsyncadd (%p1621_p4), %s282_s20, 4294967040  ;;  %p1622_p7 = scmp.eq.s32.totalorder %s1362_s28, 0 }
  0x69   : > { %1265 = dma.done.wait (%p1622_p7), [#allocation6], 4096   ;;  %p1623_p8 = pmov %p1622_p7 }
  0x6a   : > { %v1088_v0 = vld [vmem:[#allocation5 + $0x40] sm:$0xff]   ;;  %v1090_v2 = vld [vmem:[#allocation5 + $0x48] sm:$0xff]   ;;  %v1092_v4 = vld [vmem:[#allocation5 + $0x50] sm:$0xff]   ;;  %v1295_v20 = vmov 0.0   ;;  %vm1296_vm0 = vmmov 0   ;;  %v520_v35 = vlaneseq  ;;  %vm547_vm1 = vcmask 261120  }
  0x6b   : > { %1267 = vsyncadd (%p1623_p8), [#allocation6], 4294963200  ;;  %v1089_v1 = vld [vmem:[#allocation5] sm:$0xff]   ;;  %974 = vmatprep.subr.bf16.mxu0 %v1088_v0  ;;  %v1091_v3 = vld [vmem:[#allocation5 + $0x8] sm:$0xff]   ;;  %v1297_v60 = vmov 0   ;;  %vm725_vm2 = vcmask 1043456  }
  0x6c   : > { %975 = vmatpush3.bf16.msra.mxu0 %v1089_v1  ;;  %v1093_v5 = vld [vmem:[#allocation5 + $0x10] sm:$0xff]   ;;  %v1094_v6 = vld [vmem:[#allocation5 + $0x58] sm:$0xff]   ;;  %v1096_v8 = vld [vmem:[#allocation5 + $0x60] sm:$0xff]   ;;  %v521_v36 = vshrl.u32 %v520_v35, 7  ;;  %705 = vmatprep.mubr.bf16.mxu1 %v1297_v60  ;;  %vm721_vm3 = vcmask 64512   ;;  %s323_s20 = scalar_lea.vmem [#allocation8], %s922_s14 }
  0x6d   : > { %976 = vmatprep.subr.bf16.mxu0 %v1090_v2  ;;  %v1095_v7 = vld [vmem:[#allocation5 + $0x18] sm:$0xff]   ;;  %v1097_v9 = vld [vmem:[#allocation5 + $0x20] sm:$0xff]   ;;  %v1098_v10 = vld [vmem:[#allocation5 + $0x68] sm:$0xff]   ;;  %1087 = vset.pattern.permute.xlu0 %v1297_v60  ;;  %s973_s30 = sshll.u32 %s1362_s28, 8  ;;  %s808_s14 = scalar_lea.sflag [#allocation4], %s1510_s15 }
  0x6e   : > { %v381_v11 = vld [vmem:[%s1516_s21 + $0x8] sm:$0xff]  ;;  %v1100_v14 = vld [vmem:[#allocation5 + $0x70] sm:$0xff]   ;;  %v522_v37 = vsub.s32 0, %v521_v36  ;;  %v527_v38 = vsub.s32 1, %v521_v36  ;;  %v377_v39 = vld [vmem:[%s1608_s5] sm:$0xf]  ;;  %s1559_s23 = scalar_lea.hbm %s1610_s7, %s973_s30 }
  0x6f   : > { %v1099_v12 = vld [vmem:[#allocation5 + $0x28] sm:$0xff]   ;;  %v1527_v13 = vpack.c.bf16 %v381_v11, %v381_v11  ;;  %v1101_v15 = vld [vmem:[#allocation5 + $0x30] sm:$0xff]   ;;  %v1102_v16 = vld [vmem:[#allocation5 + $0x78] sm:$0xff]   ;;  %v532_v40 = vsub.s32 2, %v521_v36  ;;  %v537_v41 = vsub.s32 3, %v521_v36  ;;  %p1624_p0 = scmp.ne.s32.totalorder %s1619_s18, 0 }
  0x70   : > { %977 = vmatpush3.bf16.msra.mxu0 %v1091_v3  ;;  %v1103_v17 = vld [vmem:[#allocation5 + $0x38] sm:$0xff]   ;;  %v380_v18 = vld [vmem:[%s1516_s21] sm:$0xff]  ;;  %v523_v43 = vrot.slane %v377_v39, %v522_v37  ;;  %v528_v44 = vrot.slane %v377_v39, %v527_v38  ;;  %v379_v62 = vld [vmem:[%s1609_s6 + $0x8] sm:$0xff]  ;;  %s821_s21 = sshll.u32 %s323_s20, 4  ;;  %s1298_s28 = smov [#allocation8]   ;;  %s1554_s21 = int_to_ptr.vmem [resolvable:$true] %s821_s21 }
  0x71   : > { %978 = vmatprep.subr.bf16.mxu0 %v1092_v4  ;;  %512 = vmatprep.mubr.bf16.mxu0 %v1527_v13  ;;  %v1531_v19 = vpack.c.bf16 %v380_v18, %v380_v18  ;;  %v1105_v21 = vld [vmem:[#allocation7 + $0x4] ss:$8 sps:$4 sm:$0xff]   ;;  %v1107_v22 = vld [vmem:[#allocation7] ss:$8 sps:$4 sm:$0xff]   ;;  %v1108_v23 = vld [vmem:[#allocation7 + $0x14] ss:$8 sps:$4 sm:$0xff]   ;;  %v533_v47 = vrot.slane %v377_v39, %v532_v40  ;;  %v538_v48 = vrot.slane %v377_v39, %v537_v41 }
  0x72   : > { %673 = vmatprep.subr.bf16.mxu1 %v1105_v21  ;;  %v1110_v24 = vld [vmem:[#allocation7 + $0x10] ss:$8 sps:$4 sm:$0xff]   ;;  %v1111_v25 = vld [vmem:[#allocation7 + $0x24] ss:$8 sps:$4 sm:$0xff]   ;;  %v1113_v26 = vld [vmem:[#allocation7 + $0x20] ss:$8 sps:$4 sm:$0xff]  }
  0x73   : > { %674 = vmatpush1.bf16.msra.mxu1 %v1107_v22  ;;  %v1114_v27 = vld [vmem:[#allocation7 + $0x34] ss:$8 sps:$4 sm:$0xff]   ;;  %v1116_v28 = vld [vmem:[#allocation7 + $0x30] ss:$8 sps:$4 sm:$0xff]   ;;  %v1117_v29 = vld [vmem:[#allocation7 + $0x44] ss:$8 sps:$4 sm:$0xff]  }
  0x74   : > { %979 = vmatpush3.bf16.msra.mxu0 %v1093_v5  ;;  %675 = vmatprep.subr.bf16.mxu1 %v1108_v23  ;;  %v1119_v30 = vld [vmem:[#allocation7 + $0x40] ss:$8 sps:$4 sm:$0xff]   ;;  %v1120_v31 = vld [vmem:[#allocation7 + $0x54] ss:$8 sps:$4 sm:$0xff]   ;;  %v1122_v32 = vld [vmem:[#allocation7 + $0x50] ss:$8 sps:$4 sm:$0xff]  }
  0x75   : > { %980 = vmatprep.subr.bf16.mxu0 %v1094_v6  ;;  %v1123_v33 = vld [vmem:[#allocation7 + $0x64] ss:$8 sps:$4 sm:$0xff]   ;;  %v1125_v34 = vld [vmem:[#allocation7 + $0x60] ss:$8 sps:$4 sm:$0xff]   ;;  %v1126_v58 = vld [vmem:[#allocation7 + $0x74] ss:$8 sps:$4 sm:$0xff]  }
  0x76   : > { %v1104_v57 = vld [vmem:[%s1607_s4] sm:$0xff]   ;;  %v1128_v59 = vld [vmem:[#allocation7 + $0x70] ss:$8 sps:$4 sm:$0xff]   ;;  %v727_v4 = vsel %vm725_vm2, %v1531_v19, 0  ;;  %s1216_s29 = scalar_lea.vmem %s1554_s21, 256  ;;  %s1220_s10 = sshll.u32 %s1298_s28, 4  ;;  %s1221_s10 = int_to_ptr.vmem [resolvable:$false] %s1220_s10 }
  0x77   : > { %676 = vmatpush1.bf16.msra.mxu1 %v1110_v24  ;;  %v378_v61 = vld [vmem:[%s1609_s6] sm:$0xff]  ;;  %p1217_p11 = scmp.ne.s32.totalorder %s1554_s21, %s1216_s29  ;;  %s1222_s12 = scalar_lea.vmem %s1221_s10, 512 }
  0x78   : > { %981 = vmatpush3.bf16.msra.mxu0 %v1095_v7  ;;  %677 = vmatprep.subr.bf16.mxu1 %v1111_v25  ;;  %v1129_v5 = vld [vmem:[%s1606_s3] sm:$0xff]   ;;  %p1223_p5 = scmp.lt.s32.totalorder %s1554_s21, %s1221_s10  ;;  %p1224_p9 = scmp.lt.s32.totalorder %s1222_s12, %s1216_s29 }
  0x79   : > { %982 = vmatprep.subr.bf16.mxu0 %v1096_v8  ;;  %777 = vperm.xlu0 %1087, %v378_v61   ;;  %p1218_p1 = pnand %p1217_p11, %p1624_p0 }
  0x7a   : > { %p1225_p12 = por %p1224_p9, %p1223_p5 }
  0x7b   : > { %678 = vmatpush1.bf16.msra.mxu1 %v1113_v26  ;;  %p1219_p3 = pneg %p1218_p1 }
  0x7c   : > { %983 = vmatpush3.bf16.msra.mxu0 %v1097_v9  ;;  %679 = vmatprep.subr.bf16.mxu1 %v1114_v27 }
  0x7d   : > { %984 = vmatprep.subr.bf16.mxu0 %v1098_v10  ;;  %782 = vperm.xlu0 %1087, %v379_v62   ;;  %p1226_p2 = pnand %p1225_p12, %p1219_p3 }
  0x7f   : > { %680 = vmatpush1.bf16.msra.mxu1 %v1116_v28 }
  0x80   : > { %985 = vmatpush3.bf16.msra.mxu0 %v1099_v12  ;;  %681 = vmatprep.subr.bf16.mxu1 %v1117_v29 }
  0x81   : > { %986 = vmatprep.subr.bf16.mxu0 %v1100_v14 }
  0x83   : > { %682 = vmatpush1.bf16.msra.mxu1 %v1119_v30 }
  0x84   : > { %987 = vmatpush3.bf16.msra.mxu0 %v1101_v15  ;;  %683 = vmatprep.subr.bf16.mxu1 %v1120_v31 }
  0x85   : > { %988 = vmatprep.subr.bf16.mxu0 %v1102_v16 }
  0x87   : > { %684 = vmatpush1.bf16.msra.mxu1 %v1122_v32 }
  0x88   : > { %989 = vmatpush3.bf16.msra.mxu0 %v1103_v17  ;;  %685 = vmatprep.subr.bf16.mxu1 %v1123_v33 }
  0x89   : > { %999 = vmatprep.subr.bf16.mxu0 %v1295_v20 }
  0x8b   : > { %513 = vmatmul.mubr.bf16.vlgmr.msra.gmra.mrb[0].mxu0 %v1531_v19  ;;  %686 = vmatpush1.bf16.msra.mxu1 %v1125_v34 }
  0x8c   : > { %1003 = vmatprep.mubr.msk.bf16.mxu0 %vm1296_vm0, %v1295_v20  ;;  %687 = vmatprep.subr.bf16.mxu1 %v1126_v58 }
  0x8f   : > { %688 = vmatpush1.bf16.msra.mxu1 %v1128_v59 }
  0x90   : > { %961 = vmatprep.subr.msk.bf16.mxu1 %vm725_vm2, %v1527_v13 }
  0xf8   : > { %v778_v6 = vpop.permute.xlu0 %777 }
  0xfc   : > { %v783_v10 = vpop.permute.xlu0 %782 }
 0x15e   : > { %v990_v42 = vpop.f32.mrb[0].mxu0 }
 0x15f   : > { %v991_v45 = vpop.f32.mrb[1].mxu0 }
 0x160   : > { %v992_v46 = vadd.f32 %v991_v45, %v990_v42  ;;  %v993_v49 = vpop.f32.mrb[2].mxu0 }
 0x161   : > { %v994_v50 = vpop.f32.mrb[3].mxu0 }
 0x162   : > { %v524_v51 = vmul.f32 %v992_v46, %v523_v43  ;;  %v529_v52 = vmul.f32 %v992_v46, %v528_v44  ;;  %v534_v53 = vmul.f32 %v992_v46, %v533_v47  ;;  %v539_v54 = vmul.f32 %v992_v46, %v538_v48 }
 0x164   : > { %v540_v55 = vpack.c.bf16 %v529_v52, %v524_v51  ;;  %v541_v56 = vpack.c.bf16 %v539_v54, %v534_v53 }
 0x166   : > { %1000 = vmatpush3.bf16.msra.mxu0 %v540_v55 }
 0x167   : > { %1001 = vmatprep.subr.bf16.mxu0 %v1295_v20 }
 0x16a   : > { %1002 = vmatpush3.bf16.msra.mxu0 %v541_v56 }
 0x16d   : > { %1004 = vmatmul.mubr.msk.bf16.vlgmr.msra.gmra.mrb[4].mxu0 %vm547_vm1, %v1104_v57 }
 0x240   : > { %v585_v63 = vpop.f32.mrb[4].mxu0 }
 0x241   : > { %v1005_v0 = vpop.f32.mrb[5].mxu0 }
 0x242   : > { %v588_v1 = vpop.f32.mrb[6].mxu0 }
 0x243   : > { %v592_v2 = vpack.c.bf16 %v588_v1, %v585_v63  ;;  %v1006_v3 = vpop.f32.mrb[7].mxu0 }
 0x245   : > { %706 = vmatmul.mubr.bf16.vlgmr.msra.gmra.mrb[0].mxu1 %v592_v2 }
 0x246   : > { %733 = vmatpush1.bf16.msra.mxu1 %v727_v4  ;;  %764 = vmatprep.mubr.bf16.mxu1 %v1297_v60 }
 0x251   : > { %962 = vmatmul.mubr.msk.bf16.vlgmr.msra.gmra.mrb[0].mxu1 %vm721_vm3, %v1129_v5 }
 0x324   : > { %v766_v7 = vpop.f32.mrb[0].mxu1 }
 0x325   : > { %v785_v8 = vadd.f32 %v778_v6, %v766_v7  ;;  %v768_v9 = vpop.f32.mrb[1].mxu1 }
 0x326   : > { %v786_v11 = vadd.f32 %v778_v6, %v768_v9  ;;  %v770_v12 = vpop.f32.mrb[2].mxu1 }
 0x327   : > { %v789_v13 = vmax.f32 %v785_v8, 0.0  ;;  %v787_v14 = vadd.f32 %v783_v10, %v770_v12  ;;  %v772_v15 = vpop.f32.mrb[3].mxu1 }
 0x328   : > { %v790_v16 = vmax.f32 %v786_v11, 0.0  ;;  %v788_v17 = vadd.f32 %v783_v10, %v772_v15 }
 0x329   : > { %v791_v18 = vmax.f32 %v787_v14, 0.0 }
 0x32a   : > { %v971_v19 = vpack.c.bf16 %v790_v16, %v789_v13  ;;  %v792_v20 = vmax.f32 %v788_v17, 0.0 }
 0x32c   : > { %805 = vst [vmem:[%s323_s20] sm:$0xff] %v971_v19  ;;  %v972_v21 = vpack.c.bf16 %v792_v20, %v791_v18 }
 0x32e   : > { %806 = vst [vmem:[%s323_s20 + $0x8] sm:$0xff] %v972_v21 }
 0x32f   : > { %1229 = shalt.err (!%p1226_p2)
}
 0x330   : > { %s1230_s22 = scalar_lea.hbm %s1559_s23, 256  ;;  %s1234_s20 = scalar_lea.hbm %s1610_s7, 512 }
 0x331   : > { %p1231_p13 = scmp.ne.s32.totalorder %s1559_s23, %s1230_s22  ;;  %p1235_p4 = scmp.lt.u32.totalorder %s1559_s23, %s1610_s7 }
 0x332   : > { %p1236_p7 = scmp.lt.u32.totalorder %s1234_s20, %s1230_s22  ;;  %p1238_p11 = scmp.lt.u32.totalorder %s1230_s22, %s1559_s23 }
 0x333   : > { %p1232_p6 = pnand %p1231_p13, %p1624_p0 }
 0x334   : > { %p1237_p8 = por %p1236_p7, %p1235_p4 }
 0x335   : > { %p1233_p10 = pneg %p1232_p6 }
 0x336   : > { %p1239_p1 = por %p1238_p11, %p1237_p8 }
 0x338   : > { %p1240_p3 = pnand %p1239_p1, %p1233_p10 }
 0x33a   : > { %1243 = shalt.err (!%p1240_p3)
}
 0x33b   : > { %s1299_s11 = smov 128   ;;  %s1300_s29 = smov 8  }
 0x33c   : > { %1021 = dma.vmem_to_hbm [thread:$0]  (%p1624_p0), %s1554_s21, 256, %s1559_s23, %s808_s14, %s1299_s11, %s1299_s11, %s1300_s29  }
 0x33d PF: > { %s836_s28 = sand.u32 1, %s1274_s24   ;;  %p1625_p5 = scmp.ne.s32.totalorder %s1615_s8, 0 }
 0x33e   : > { %p1626_p9 = scmp.ge.s32.totalorder %s1286_s27, 2  ;;  %s837_s10 = scalar_lea.sflag [#allocation4], %s836_s28 }
 0x340   : > { %p1035_p12 = pnand %p1626_p9, %p1625_p5 }
 0x342   : > { %1269 = dma.done.wait (!%p1035_p12), %s837_s10, 256  }
 0x343   : > { %1271 = vsyncadd (!%p1035_p12), %s837_s10, 4294967040  ;;  %p21_p2 = scmp.ge.s32.totalorder %s1451_s13, 4   ;;  %s1627_s24 = smov %s1278_s25 }
 0x344   : > { %s1628_s25 = smov %s1282_s26  ;;  %s1629_s26 = smov %s1460_s17 }
 0x345   : > { %s1630_s27 = smov %s1451_s13  ;;  %23 = sbr.rel (!%p21_p2) target bundleno = 6 (0x6), region = 101 }
 0x34c   :  { %842 = vsyncpa [#allocation3], 1 }
 0x34d   :  { %844 = vsyncpa [#allocation3 + $0x1], 1 }
 0x34e   :  { %845 = vsyncpa [#allocation6], 1 }
 0x34f   :  { %846 = vsyncpa [#allocation4], 1 }
 0x350   :  { %848 = vsyncpa [#allocation4 + $0x1], 1 }

// kernel: tpu_custom_call.1
= control target key start
LH: loop header
LB: loop body
LE: loop exit
PB: predicated region body
PF: predicated region fallthrough
CT: control target
= control target key end

     0   :  { %12 = vsyncpa [#allocation3], 0  ;;  %s1603_s0 = inlined_call_operand.hbm [shape: f32[2,8,256], index: 0, kind: input, shape index: {}]   ;;  %s1604_s1 = inlined_call_operand.hbm [shape: bf16[256,128], index: 1, kind: input, shape index: {}]   ;;  %s1605_s2 = inlined_call_operand.hbm [shape: bf16[128,256], index: 2, kind: input, shape index: {}]   ;;  %s1606_s3 = inlined_call_operand.vmem [shape: bf16[16,8], index: 3, kind: input, shape index: {}]   ;;  %s1607_s4 = inlined_call_operand.vmem [shape: bf16[16,32], index: 4, kind: input, shape index: {}]   ;;  %s1608_s5 = inlined_call_operand.vmem [shape: f32[4,128], index: 5, kind: input, shape index: {}]   ;;  %s1609_s6 = inlined_call_operand.vmem [shape: f32[16,1], index: 6, kind: input, shape index: {}]   ;;  %s1610_s7 = inlined_call_operand.hbm [shape: bf16[2,16,256], index: 7, kind: output, shape index: {}]  }
   0x1   :  { %14 = vsyncpa [#allocation3 + $0x1], 0 }
   0x2   :  { %15 = vsyncpa [#allocation6], 0 }
   0x3   :  { %16 = vsyncpa [#allocation4], 0 }
   0x4   :  { %18 = vsyncpa [#allocation4 + $0x1], 0  ;;  %s1341_s24 = smov 0   ;;  %s1343_s25 = smov 0  }
   0x5   :  { %s1345_s26 = smov 0   ;;  %s1347_s27 = smov 0  }
   0x6 LB: > { %s1362_s28 = sadd.s32 4294967295, %s1286_s27   ;;  %s913_s29 = sadd.s32 4294967294, %s1286_s27   ;;  %s1286_s27 = sphi %s1347_s27, %s1630_s27   ;;  %s1282_s26 = sphi %s1345_s26, %s1629_s26   ;;  %s1278_s25 = sphi %s1343_s25, %s1628_s25   ;;  %s1274_s24 = sphi %s1341_s24, %s1627_s24  }
   0x7   : > { %p44_p0 = scmp.ne.s32.totalorder %s1278_s25, %s1274_s24  ;;  %p1611_p1 = scmp.eq.s32.totalorder %s1362_s28, 0 }
   0x8   : > { %p200_p3 = scmp.eq.s32.totalorder %s913_s29, 1  ;;  %p914_p5 = scmp.ge.s32.totalorder %s1286_s27, 1 }
   0x9   : > { %p1371_p4 = por %p1611_p1, %p44_p0  ;;  %p207_p7 = scmp.lt.s32.totalorder %s1286_s27, 3 }
   0xa   : > { %p1376_p6 = por %p200_p3, %p44_p0  ;;  %s1288_s10 = smov [#allocation5]  }
   0xb   : > { %s1614_s30 = scalar_select %p1371_p4, 1, 0 }
   0xc   : > { %s1615_s8 = scalar_select %p1376_p6, 1, 0 }
   0xd   : > { %p1381_p8 = pnand %p914_p5, %p207_p7  ;;  %s219_s11 = sshll.u32 %s1288_s10, 4  ;;  %s1385_s11 = int_to_ptr.vmem [resolvable:$true] %s219_s11 }
   0xe   : > { %s1289_s13 = smov [#allocation7]   ;;  %s1130_s17 = scalar_lea.hbm %s1604_s1, 2048 }
   0xf   : > { %p1023_p9 = pneg %p1381_p8  ;;  %s232_s14 = sshll.u32 %s1289_s13, 4  ;;  %s1396_s14 = int_to_ptr.vmem [resolvable:$true] %s232_s14 }
  0x10   : > { %p1131_p12 = scmp.ne.s32.totalorder %s1604_s1, %s1130_s17  ;;  %p1137_p5 = scmp.lt.u32.totalorder %s1130_s17, %s1604_s1 }
  0x11   : > { %p1392_p11 = pnand %p1023_p9, %p1611_p1 }
  0x13   : > { %p1132_p13 = pneg %p1392_p11 }
  0x15   : > { %p1133_p0 = pnand %p1132_p13, %p1131_p12 }
  0x17   : > { %p1134_p3 = pneg %p1133_p0 }
  0x19   : > { %p1139_p7 = pnand %p1137_p5, %p1134_p3 }
  0x1b   : > { %1142 = shalt.err (!%p1139_p7)
}
  0x1c   : > { %s1143_s22 = scalar_lea.vmem %s1385_s11, 2048  ;;  %p1151_p2 = scmp.lt.s32.totalorder %s1385_s11, %s1385_s11 }
  0x1d   : > { %p1144_p9 = scmp.ne.s32.totalorder %s1385_s11, %s1143_s22  ;;  %p1152_p12 = scmp.lt.s32.totalorder %s1143_s22, %s1143_s22 }
  0x1f   : > { %p1146_p10 = pnand %p1144_p9, %p1132_p13  ;;  %p1153_p0 = por %p1152_p12, %p1151_p2 }
  0x21   : > { %p1147_p1 = pneg %p1146_p10 }
  0x23   : > { %p1154_p6 = pnand %p1153_p0, %p1147_p1 }
  0x25   : > { %1157 = shalt.err (!%p1154_p6)
}
  0x26   : > { %s1290_s23 = smov 64   ;;  %s1291_s29 = smov 4  }
  0x27   : > { %1026 = dma.hbm_to_vmem [thread:$0]  (!%p1392_p11), %s1604_s1, 2048, %s1385_s11, [#allocation6], %s1290_s23, %s1290_s23, %s1291_s29  }
  0x28   : > { %s1158_s17 = scalar_lea.hbm %s1605_s2, 2048 }
  0x29   : > { %p1159_p2 = scmp.ne.s32.totalorder %s1605_s2, %s1158_s17  ;;  %p1165_p10 = scmp.lt.u32.totalorder %s1158_s17, %s1605_s2 }
  0x2b   : > { %p1161_p1 = pnand %p1159_p2, %p1132_p13 }
  0x2d   : > { %p1162_p6 = pneg %p1161_p1 }
  0x2f   : > { %p1167_p3 = pnand %p1165_p10, %p1162_p6 }
  0x31   : > { %1170 = shalt.err (!%p1167_p3)
}
  0x32   : > { %s1171_s11 = scalar_lea.vmem %s1396_s14, 2048  ;;  %p1179_p12 = scmp.lt.s32.totalorder %s1396_s14, %s1396_s14 }
  0x33   : > { %p1172_p5 = scmp.ne.s32.totalorder %s1396_s14, %s1171_s11  ;;  %p1180_p0 = scmp.lt.s32.totalorder %s1171_s11, %s1171_s11 }
  0x35   : > { %p1174_p7 = pnand %p1172_p5, %p1132_p13  ;;  %p1181_p2 = por %p1180_p0, %p1179_p12 }
  0x37   : > { %p1175_p9 = pneg %p1174_p7 }
  0x39   : > { %p1182_p1 = pnand %p1181_p2, %p1175_p9 }
  0x3b   : > { %1185 = shalt.err (!%p1182_p1)
}
  0x3c   : > { %s1292_s22 = smov 128   ;;  %s1293_s23 = smov 8  }
  0x3d   : > { %1029 = dma.hbm_to_vmem [thread:$0]  (!%p1392_p11), %s1605_s2, 2048, %s1396_s14, [#allocation6], %s1292_s22, %s1292_s22, %s1293_s23  }
  0x3e   : > { %s1451_s13 = sadd.s32 1, %s1286_s27   ;;  %s31_s16 = sadd.s32 1, %s1282_s26 }
  0x3f   : > { %s28_s15 = ssub.s32 %s1286_s27, %s1451_s13  ;;  %p38_p6 = scmp.ne.s32.totalorder %s1282_s26, %s1278_s25 }
  0x40   : > { %p29_p13 = scmp.eq.s32.totalorder %s28_s15, 0  ;;  %p39_p10 = scmp.eq.s32.totalorder %s1286_s27, 0 }
  0x41   : > { %p1618_p5 = scmp.eq.s32.totalorder %s1362_s28, 1  ;;  %p1040_p9 = scmp.lt.s32.totalorder %s1286_s27, 2 }
  0x42   : > { %s1460_s17 = scalar_select %p29_p13, %s1282_s26, %s31_s16  }
  0x43   : > { %p40_p3 = por %p39_p10, %p38_p6  ;;  %p1464_p7 = por %p1618_p5, %p38_p6 }
  0x44   : > { %s258_s12 = sand.u32 1, %s1282_s26   ;;  %s970_s14 = sshll.u32 %s1286_s27, 8 }
  0x45   : > { %s1619_s18 = scalar_select %p1464_p7, 1, 0 }
  0x46   : > { %s918_s19 = sshll.u32 %s258_s12, 4  ;;  %s1474_s11 = scalar_lea.hbm %s1603_s0, %s970_s14 }
  0x47   : > { %s262_s22 = scalar_lea.vmem [#allocation2], %s918_s19  ;;  %p1478_p11 = pnand %p1040_p9, %p40_p3 }
  0x48   : > { %s270_s23 = sshll.u32 %s262_s22, 4  ;;  %s259_s10 = scalar_lea.sflag [#allocation3], %s258_s12  ;;  %s1476_s23 = int_to_ptr.vmem [resolvable:$true] %s270_s23 }
  0x49   : > { %s1186_s15 = scalar_lea.hbm %s1474_s11, 256  ;;  %p1188_p0 = pneg %p1478_p11 }
  0x4a   : > { %p1187_p12 = scmp.ne.s32.totalorder %s1474_s11, %s1186_s15  ;;  %s1191_s14 = scalar_lea.hbm %s1603_s0, 512 }
  0x4b   : > { %p1192_p13 = scmp.lt.u32.totalorder %s1474_s11, %s1603_s0  ;;  %p1193_p6 = scmp.lt.u32.totalorder %s1191_s14, %s1186_s15 }
  0x4c   : > { %p1189_p2 = pnand %p1188_p0, %p1187_p12  ;;  %p1195_p3 = scmp.lt.u32.totalorder %s1186_s15, %s1474_s11 }
  0x4d   : > { %p1194_p10 = por %p1193_p6, %p1192_p13 }
  0x4e   : > { %p1190_p1 = pneg %p1189_p2 }
  0x4f   : > { %p1196_p5 = por %p1195_p3, %p1194_p10 }
  0x51   : > { %p1197_p9 = pnand %p1196_p5, %p1190_p1 }
  0x53   : > { %1200 = shalt.err (!%p1197_p9)
}
  0x54   : > { %s1201_s12 = scalar_lea.vmem %s1476_s23, 256  ;;  %s1294_s22 = smov [#allocation2]  }
  0x55   : > { %p1202_p12 = scmp.ne.s32.totalorder %s1476_s23, %s1201_s12  ;;  %s1206_s16 = sshll.u32 %s1294_s22, 4  ;;  %s1207_s16 = int_to_ptr.vmem [resolvable:$false] %s1206_s16 }
  0x56   : > { %s1208_s19 = scalar_lea.vmem %s1207_s16, 512  ;;  %p1209_p4 = scmp.lt.s32.totalorder %s1476_s23, %s1207_s16 }
  0x57   : > { %p1204_p2 = pnand %p1202_p12, %p1188_p0  ;;  %p1210_p13 = scmp.lt.s32.totalorder %s1208_s19, %s1201_s12 }
  0x59   : > { %p1205_p7 = pneg %p1204_p2  ;;  %p1211_p6 = por %p1210_p13, %p1209_p4 }
  0x5b   : > { %p1212_p10 = pnand %p1211_p6, %p1205_p7 }
  0x5d   : > { %1215 = shalt.err (!%p1212_p10)
}
  0x5e   : > { %1033 = dma.hbm_to_vmem [thread:$0]  (!%p1478_p11), %s1474_s11, 256, %s1476_s23, %s259_s10  }
  0x5f   : > { %279 = sbr.rel (%p1381_p8) target bundleno = 829 (0x33d), region = 48  ;;  %s1510_s15 = sand.u32 (!%p1381_p8), 1, %s1278_s25  }
  0x60   : > { %s922_s14 = sshll.u32 (!%p1381_p8), %s1510_s15, 4  ;;  %s282_s20 = scalar_lea.sflag (!%p1381_p8), [#allocation3], %s1510_s15 }
  0x61   : > { %s1516_s21 = scalar_lea.vmem (!%p1381_p8), [#allocation2], %s922_s14  ;;  %p1621_p4 = scmp.ne.s32.totalorder (!%p1381_p8), %s1614_s30, 0 }
  0x66   : > { %1261 = dma.done.wait (%p1621_p4), %s282_s20, 256  }
  0x67   : > { %1263 = vsyncadd (%p1621_p4), %s282_s20, 4294967040  ;;  %p1622_p7 = scmp.eq.s32.totalorder %s1362_s28, 0 }
  0x69   : > { %1265 = dma.done.wait (%p1622_p7), [#allocation6], 4096   ;;  %p1623_p8 = pmov %p1622_p7 }
  0x6a   : > { %v1088_v0 = vld [vmem:[#allocation5 + $0x40] sm:$0xff]   ;;  %v1090_v2 = vld [vmem:[#allocation5 + $0x48] sm:$0xff]   ;;  %v1092_v4 = vld [vmem:[#allocation5 + $0x50] sm:$0xff]   ;;  %v1295_v20 = vmov 0.0   ;;  %vm1296_vm0 = vmmov 0   ;;  %v520_v35 = vlaneseq  ;;  %vm547_vm1 = vcmask 261120  }
  0x6b   : > { %1267 = vsyncadd (%p1623_p8), [#allocation6], 4294963200  ;;  %v1089_v1 = vld [vmem:[#allocation5] sm:$0xff]   ;;  %974 = vmatprep.subr.bf16.mxu0 %v1088_v0  ;;  %v1091_v3 = vld [vmem:[#allocation5 + $0x8] sm:$0xff]   ;;  %v1297_v60 = vmov 0   ;;  %vm725_vm2 = vcmask 1043456  }
  0x6c   : > { %975 = vmatpush3.bf16.msra.mxu0 %v1089_v1  ;;  %v1093_v5 = vld [vmem:[#allocation5 + $0x10] sm:$0xff]   ;;  %v1094_v6 = vld [vmem:[#allocation5 + $0x58] sm:$0xff]   ;;  %v1096_v8 = vld [vmem:[#allocation5 + $0x60] sm:$0xff]   ;;  %v521_v36 = vshrl.u32 %v520_v35, 7  ;;  %705 = vmatprep.mubr.bf16.mxu1 %v1297_v60  ;;  %vm721_vm3 = vcmask 64512   ;;  %s323_s20 = scalar_lea.vmem [#allocation8], %s922_s14 }
  0x6d   : > { %976 = vmatprep.subr.bf16.mxu0 %v1090_v2  ;;  %v1095_v7 = vld [vmem:[#allocation5 + $0x18] sm:$0xff]   ;;  %v1097_v9 = vld [vmem:[#allocation5 + $0x20] sm:$0xff]   ;;  %v1098_v10 = vld [vmem:[#allocation5 + $0x68] sm:$0xff]   ;;  %1087 = vset.pattern.permute.xlu0 %v1297_v60  ;;  %s973_s30 = sshll.u32 %s1362_s28, 8  ;;  %s808_s14 = scalar_lea.sflag [#allocation4], %s1510_s15 }
  0x6e   : > { %v381_v11 = vld [vmem:[%s1516_s21 + $0x8] sm:$0xff]  ;;  %v1100_v14 = vld [vmem:[#allocation5 + $0x70] sm:$0xff]   ;;  %v522_v37 = vsub.s32 0, %v521_v36  ;;  %v527_v38 = vsub.s32 1, %v521_v36  ;;  %v377_v39 = vld [vmem:[%s1608_s5] sm:$0xf]  ;;  %s1559_s23 = scalar_lea.hbm %s1610_s7, %s973_s30 }
  0x6f   : > { %v1099_v12 = vld [vmem:[#allocation5 + $0x28] sm:$0xff]   ;;  %v1527_v13 = vpack.c.bf16 %v381_v11, %v381_v11  ;;  %v1101_v15 = vld [vmem:[#allocation5 + $0x30] sm:$0xff]   ;;  %v1102_v16 = vld [vmem:[#allocation5 + $0x78] sm:$0xff]   ;;  %v532_v40 = vsub.s32 2, %v521_v36  ;;  %v537_v41 = vsub.s32 3, %v521_v36  ;;  %p1624_p0 = scmp.ne.s32.totalorder %s1619_s18, 0 }
  0x70   : > { %977 = vmatpush3.bf16.msra.mxu0 %v1091_v3  ;;  %v1103_v17 = vld [vmem:[#allocation5 + $0x38] sm:$0xff]   ;;  %v380_v18 = vld [vmem:[%s1516_s21] sm:$0xff]  ;;  %v523_v43 = vrot.slane %v377_v39, %v522_v37  ;;  %v528_v44 = vrot.slane %v377_v39, %v527_v38  ;;  %v379_v62 = vld [vmem:[%s1609_s6 + $0x8] sm:$0xff]  ;;  %s821_s21 = sshll.u32 %s323_s20, 4  ;;  %s1298_s28 = smov [#allocation8]   ;;  %s1554_s21 = int_to_ptr.vmem [resolvable:$true] %s821_s21 }
  0x71   : > { %978 = vmatprep.subr.bf16.mxu0 %v1092_v4  ;;  %512 = vmatprep.mubr.bf16.mxu0 %v1527_v13  ;;  %v1531_v19 = vpack.c.bf16 %v380_v18, %v380_v18  ;;  %v1105_v21 = vld [vmem:[#allocation7 + $0x4] ss:$8 sps:$4 sm:$0xff]   ;;  %v1107_v22 = vld [vmem:[#allocation7] ss:$8 sps:$4 sm:$0xff]   ;;  %v1108_v23 = vld [vmem:[#allocation7 + $0x14] ss:$8 sps:$4 sm:$0xff]   ;;  %v533_v47 = vrot.slane %v377_v39, %v532_v40  ;;  %v538_v48 = vrot.slane %v377_v39, %v537_v41 }
  0x72   : > { %673 = vmatprep.subr.bf16.mxu1 %v1105_v21  ;;  %v1110_v24 = vld [vmem:[#allocation7 + $0x10] ss:$8 sps:$4 sm:$0xff]   ;;  %v1111_v25 = vld [vmem:[#allocation7 + $0x24] ss:$8 sps:$4 sm:$0xff]   ;;  %v1113_v26 = vld [vmem:[#allocation7 + $0x20] ss:$8 sps:$4 sm:$0xff]  }
  0x73   : > { %674 = vmatpush1.bf16.msra.mxu1 %v1107_v22  ;;  %v1114_v27 = vld [vmem:[#allocation7 + $0x34] ss:$8 sps:$4 sm:$0xff]   ;;  %v1116_v28 = vld [vmem:[#allocation7 + $0x30] ss:$8 sps:$4 sm:$0xff]   ;;  %v1117_v29 = vld [vmem:[#allocation7 + $0x44] ss:$8 sps:$4 sm:$0xff]  }
  0x74   : > { %979 = vmatpush3.bf16.msra.mxu0 %v1093_v5  ;;  %675 = vmatprep.subr.bf16.mxu1 %v1108_v23  ;;  %v1119_v30 = vld [vmem:[#allocation7 + $0x40] ss:$8 sps:$4 sm:$0xff]   ;;  %v1120_v31 = vld [vmem:[#allocation7 + $0x54] ss:$8 sps:$4 sm:$0xff]   ;;  %v1122_v32 = vld [vmem:[#allocation7 + $0x50] ss:$8 sps:$4 sm:$0xff]  }
  0x75   : > { %980 = vmatprep.subr.bf16.mxu0 %v1094_v6  ;;  %v1123_v33 = vld [vmem:[#allocation7 + $0x64] ss:$8 sps:$4 sm:$0xff]   ;;  %v1125_v34 = vld [vmem:[#allocation7 + $0x60] ss:$8 sps:$4 sm:$0xff]   ;;  %v1126_v58 = vld [vmem:[#allocation7 + $0x74] ss:$8 sps:$4 sm:$0xff]  }
  0x76   : > { %v1104_v57 = vld [vmem:[%s1607_s4] sm:$0xff]   ;;  %v1128_v59 = vld [vmem:[#allocation7 + $0x70] ss:$8 sps:$4 sm:$0xff]   ;;  %v727_v4 = vsel %vm725_vm2, %v1531_v19, 0  ;;  %s1216_s29 = scalar_lea.vmem %s1554_s21, 256  ;;  %s1220_s10 = sshll.u32 %s1298_s28, 4  ;;  %s1221_s10 = int_to_ptr.vmem [resolvable:$false] %s1220_s10 }
  0x77   : > { %676 = vmatpush1.bf16.msra.mxu1 %v1110_v24  ;;  %v378_v61 = vld [vmem:[%s1609_s6] sm:$0xff]  ;;  %p1217_p11 = scmp.ne.s32.totalorder %s1554_s21, %s1216_s29  ;;  %s1222_s12 = scalar_lea.vmem %s1221_s10, 512 }
  0x78   : > { %981 = vmatpush3.bf16.msra.mxu0 %v1095_v7  ;;  %677 = vmatprep.subr.bf16.mxu1 %v1111_v25  ;;  %v1129_v5 = vld [vmem:[%s1606_s3] sm:$0xff]   ;;  %p1223_p5 = scmp.lt.s32.totalorder %s1554_s21, %s1221_s10  ;;  %p1224_p9 = scmp.lt.s32.totalorder %s1222_s12, %s1216_s29 }
  0x79   : > { %982 = vmatprep.subr.bf16.mxu0 %v1096_v8  ;;  %777 = vperm.xlu0 %1087, %v378_v61   ;;  %p1218_p1 = pnand %p1217_p11, %p1624_p0 }
  0x7a   : > { %p1225_p12 = por %p1224_p9, %p1223_p5 }
  0x7b   : > { %678 = vmatpush1.bf16.msra.mxu1 %v1113_v26  ;;  %p1219_p3 = pneg %p1218_p1 }
  0x7c   : > { %983 = vmatpush3.bf16.msra.mxu0 %v1097_v9  ;;  %679 = vmatprep.subr.bf16.mxu1 %v1114_v27 }
  0x7d   : > { %984 = vmatprep.subr.bf16.mxu0 %v1098_v10  ;;  %782 = vperm.xlu0 %1087, %v379_v62   ;;  %p1226_p2 = pnand %p1225_p12, %p1219_p3 }
  0x7f   : > { %680 = vmatpush1.bf16.msra.mxu1 %v1116_v28 }
  0x80   : > { %985 = vmatpush3.bf16.msra.mxu0 %v1099_v12  ;;  %681 = vmatprep.subr.bf16.mxu1 %v1117_v29 }
  0x81   : > { %986 = vmatprep.subr.bf16.mxu0 %v1100_v14 }
  0x83   : > { %682 = vmatpush1.bf16.msra.mxu1 %v1119_v30 }
  0x84   : > { %987 = vmatpush3.bf16.msra.mxu0 %v1101_v15  ;;  %683 = vmatprep.subr.bf16.mxu1 %v1120_v31 }
  0x85   : > { %988 = vmatprep.subr.bf16.mxu0 %v1102_v16 }
  0x87   : > { %684 = vmatpush1.bf16.msra.mxu1 %v1122_v32 }
  0x88   : > { %989 = vmatpush3.bf16.msra.mxu0 %v1103_v17  ;;  %685 = vmatprep.subr.bf16.mxu1 %v1123_v33 }
  0x89   : > { %999 = vmatprep.subr.bf16.mxu0 %v1295_v20 }
  0x8b   : > { %513 = vmatmul.mubr.bf16.vlgmr.msra.gmra.mrb[0].mxu0 %v1531_v19  ;;  %686 = vmatpush1.bf16.msra.mxu1 %v1125_v34 }
  0x8c   : > { %1003 = vmatprep.mubr.msk.bf16.mxu0 %vm1296_vm0, %v1295_v20  ;;  %687 = vmatprep.subr.bf16.mxu1 %v1126_v58 }
  0x8f   : > { %688 = vmatpush1.bf16.msra.mxu1 %v1128_v59 }
  0x90   : > { %961 = vmatprep.subr.msk.bf16.mxu1 %vm725_vm2, %v1527_v13 }
  0xf8   : > { %v778_v6 = vpop.permute.xlu0 %777 }
  0xfc   : > { %v783_v10 = vpop.permute.xlu0 %782 }
 0x15e   : > { %v990_v42 = vpop.f32.mrb[0].mxu0 }
 0x15f   : > { %v991_v45 = vpop.f32.mrb[1].mxu0 }
 0x160   : > { %v992_v46 = vadd.f32 %v991_v45, %v990_v42  ;;  %v993_v49 = vpop.f32.mrb[2].mxu0 }
 0x161   : > { %v994_v50 = vpop.f32.mrb[3].mxu0 }
 0x162   : > { %v524_v51 = vmul.f32 %v992_v46, %v523_v43  ;;  %v529_v52 = vmul.f32 %v992_v46, %v528_v44  ;;  %v534_v53 = vmul.f32 %v992_v46, %v533_v47  ;;  %v539_v54 = vmul.f32 %v992_v46, %v538_v48 }
 0x164   : > { %v540_v55 = vpack.c.bf16 %v529_v52, %v524_v51  ;;  %v541_v56 = vpack.c.bf16 %v539_v54, %v534_v53 }
 0x166   : > { %1000 = vmatpush3.bf16.msra.mxu0 %v540_v55 }
 0x167   : > { %1001 = vmatprep.subr.bf16.mxu0 %v1295_v20 }
 0x16a   : > { %1002 = vmatpush3.bf16.msra.mxu0 %v541_v56 }
 0x16d   : > { %1004 = vmatmul.mubr.msk.bf16.vlgmr.msra.gmra.mrb[4].mxu0 %vm547_vm1, %v1104_v57 }
 0x240   : > { %v585_v63 = vpop.f32.mrb[4].mxu0 }
 0x241   : > { %v1005_v0 = vpop.f32.mrb[5].mxu0 }
 0x242   : > { %v588_v1 = vpop.f32.mrb[6].mxu0 }
 0x243   : > { %v592_v2 = vpack.c.bf16 %v588_v1, %v585_v63  ;;  %v1006_v3 = vpop.f32.mrb[7].mxu0 }
 0x245   : > { %706 = vmatmul.mubr.bf16.vlgmr.msra.gmra.mrb[0].mxu1 %v592_v2 }
 0x246   : > { %733 = vmatpush1.bf16.msra.mxu1 %v727_v4  ;;  %764 = vmatprep.mubr.bf16.mxu1 %v1297_v60 }
 0x251   : > { %962 = vmatmul.mubr.msk.bf16.vlgmr.msra.gmra.mrb[0].mxu1 %vm721_vm3, %v1129_v5 }
 0x324   : > { %v766_v7 = vpop.f32.mrb[0].mxu1 }
 0x325   : > { %v785_v8 = vadd.f32 %v778_v6, %v766_v7  ;;  %v768_v9 = vpop.f32.mrb[1].mxu1 }
 0x326   : > { %v786_v11 = vadd.f32 %v778_v6, %v768_v9  ;;  %v770_v12 = vpop.f32.mrb[2].mxu1 }
 0x327   : > { %v789_v13 = vmax.f32 %v785_v8, 0.0  ;;  %v787_v14 = vadd.f32 %v783_v10, %v770_v12  ;;  %v772_v15 = vpop.f32.mrb[3].mxu1 }
 0x328   : > { %v790_v16 = vmax.f32 %v786_v11, 0.0  ;;  %v788_v17 = vadd.f32 %v783_v10, %v772_v15 }
 0x329   : > { %v791_v18 = vmax.f32 %v787_v14, 0.0 }
 0x32a   : > { %v971_v19 = vpack.c.bf16 %v790_v16, %v789_v13  ;;  %v792_v20 = vmax.f32 %v788_v17, 0.0 }
 0x32c   : > { %805 = vst [vmem:[%s323_s20] sm:$0xff] %v971_v19  ;;  %v972_v21 = vpack.c.bf16 %v792_v20, %v791_v18 }
 0x32e   : > { %806 = vst [vmem:[%s323_s20 + $0x8] sm:$0xff] %v972_v21 }
 0x32f   : > { %1229 = shalt.err (!%p1226_p2)
}
 0x330   : > { %s1230_s22 = scalar_lea.hbm %s1559_s23, 256  ;;  %s1234_s20 = scalar_lea.hbm %s1610_s7, 512 }
 0x331   : > { %p1231_p13 = scmp.ne.s32.totalorder %s1559_s23, %s1230_s22  ;;  %p1235_p4 = scmp.lt.u32.totalorder %s1559_s23, %s1610_s7 }
 0x332   : > { %p1236_p7 = scmp.lt.u32.totalorder %s1234_s20, %s1230_s22  ;;  %p1238_p11 = scmp.lt.u32.totalorder %s1230_s22, %s1559_s23 }
 0x333   : > { %p1232_p6 = pnand %p1231_p13, %p1624_p0 }
 0x334   : > { %p1237_p8 = por %p1236_p7, %p1235_p4 }
 0x335   : > { %p1233_p10 = pneg %p1232_p6 }
 0x336   : > { %p1239_p1 = por %p1238_p11, %p1237_p8 }
 0x338   : > { %p1240_p3 = pnand %p1239_p1, %p1233_p10 }
 0x33a   : > { %1243 = shalt.err (!%p1240_p3)
}
 0x33b   : > { %s1299_s11 = smov 128   ;;  %s1300_s29 = smov 8  }
 0x33c   : > { %1021 = dma.vmem_to_hbm [thread:$0]  (%p1624_p0), %s1554_s21, 256, %s1559_s23, %s808_s14, %s1299_s11, %s1299_s11, %s1300_s29  }
 0x33d PF: > { %s836_s28 = sand.u32 1, %s1274_s24   ;;  %p1625_p5 = scmp.ne.s32.totalorder %s1615_s8, 0 }
 0x33e   : > { %p1626_p9 = scmp.ge.s32.totalorder %s1286_s27, 2  ;;  %s837_s10 = scalar_lea.sflag [#allocation4], %s836_s28 }
 0x340   : > { %p1035_p12 = pnand %p1626_p9, %p1625_p5 }
 0x342   : > { %1269 = dma.done.wait (!%p1035_p12), %s837_s10, 256  }
 0x343   : > { %1271 = vsyncadd (!%p1035_p12), %s837_s10, 4294967040  ;;  %p21_p2 = scmp.ge.s32.totalorder %s1451_s13, 4   ;;  %s1627_s24 = smov %s1278_s25 }
 0x344   : > { %s1628_s25 = smov %s1282_s26  ;;  %s1629_s26 = smov %s1460_s17 }
 0x345   : > { %s1630_s27 = smov %s1451_s13  ;;  %23 = sbr.rel (!%p21_p2) target bundleno = 6 (0x6), region = 101 }
 0x34c   :  { %842 = vsyncpa [#allocation3], 1 }
 0x34d   :  { %844 = vsyncpa [#allocation3 + $0x1], 1 }
 0x34e   :  { %845 = vsyncpa [#allocation6], 1 }
 0x34f   :  { %846 = vsyncpa [#allocation4], 1 }
 0x350   :  { %848 = vsyncpa [#allocation4 + $0x1], 1 }

</bundles_post_ra>
